<compile_context>
chip_gen: v6e
topology: v6e:2x2x1
jax: 0.10.0
libtpu: 0.0.40
codegen_flags: <defaults>
</compile_context>

<pallas_src>
import functools

import jax
import jax.numpy as jnp
from jax import lax
from jax.experimental import pallas as pl
from jax.experimental.pallas import tpu as pltpu


def _round_up(x, mult):
    return (x + mult - 1) // mult * mult


def _contrastive_loss_kernel(r_ref, c_ref, lab_ref, out_ref, *,
                             margin, activation_opt, inv_count,
                             n_valid, m_valid, needs_mask):
    i = pl.program_id(0)
    j = pl.program_id(1)

    # Zero the resident scalar accumulator on the first grid step.
    @pl.when((i == 0) & (j == 0))
    def _():
        out_ref[...] = jnp.zeros_like(out_ref)

    r = r_ref[...]                                   # (TM, D), input dtype
    c = c_ref[...]                                   # (TN, D), input dtype
    lab = lab_ref[...].astype(jnp.float32)           # (TM, TN), int8 -> f32

    # NT matmul on the MXU: contract the feature (last) dims of both operands
    # directly -- no c.T relayout.  f32 accumulation.
    gram = lax.dot_general(
        r, c,
        dimension_numbers=(((1,), (1,)), ((), ())),
        preferred_element_type=jnp.float32)          # (TM, TN)

    r32 = r.astype(jnp.float32)
    c32 = c.astype(jnp.float32)
    r_sq = jnp.sum(r32 * r32, axis=1, keepdims=True)            # (TM, 1)
    # ||c||^2 directly as a (1, TN) row via a ones-vector matmul (avoids an
    # (M,1) -> (1,M) XLU transpose in the epilogue).
    ones_row = jnp.ones((1, c32.shape[1]), jnp.float32)
    c_sq = lax.dot_general(
        ones_row, c32 * c32,
        dimension_numbers=(((1,), (1,)), ((), ())),
        preferred_element_type=jnp.float32)                      # (1, TN)

    # Squared pairwise Euclidean distances.
    d2 = jnp.maximum(r_sq + c_sq - 2.0 * gram, 0.0)              # (TM, TN)
    d = jnp.sqrt(d2)
    if activation_opt:
        d = jax.nn.sigmoid(d)
        pos = d * d
    else:
        pos = d2          # use d2 directly; no sqrt -> square round trip

    hinge = jnp.maximum(margin - d, 0.0)
    loss = (1.0 - lab) * pos + lab * (hinge * hinge)

    if needs_mask:
        tm, tn = loss.shape
        row = lax.broadcasted_iota(jnp.int32, (tm, tn), 0) + i * tm
        col = lax.broadcasted_iota(jnp.int32, (tm, tn), 1) + j * tn
        loss = jnp.where((row < n_valid) & (col < m_valid), loss, 0.0)

    out_ref[...] += jnp.sum(loss, keepdims=True)

    # Normalize (mean) once, on the last grid step, before final writeback.
    @pl.when((i == pl.num_programs(0) - 1) & (j == pl.num_programs(1) - 1))
    def _():
        out_ref[...] = out_ref[...] * inv_count


def contrastive_loss(reference, components, labels, *,
                     margin=2.0, activation_opt=False,
                     tile_m=256, tile_n=256):
    """Pallas equivalent of ContrastiveLoss(margin).forward(...)."""
    n, feat = reference.shape
    m, feat2 = components.shape
    assert feat == feat2, "feature dims must match"
    assert labels.shape == (n * m,), "labels must match flattened (N*M,) cdist"

    # Contrastive labels are binary {0,1}: ship them as int8 (4x less HBM
    # traffic than f32 on the dominant (N, M) stream) and cast in-kernel.
    labels_2d = labels.reshape(n, m).astype(jnp.int8)

    # Tile sizes: rows in multiples of 32 (covers int8/bf16/f32 sublane
    # packing), cols in multiples of 128 (lane width); clamped so tiny
    # problems stay a single block.
    tm = min(_round_up(tile_m, 32), _round_up(n, 32))
    tn = min(_round_up(tile_n, 128), _round_up(m, 128))
    n_pad = _round_up(n, tm)
    m_pad = _round_up(m, tn)
    needs_mask = (n_pad != n) or (m_pad != m)

    if n_pad != n:
        reference = jnp.pad(reference, ((0, n_pad - n), (0, 0)))
    if m_pad != m:
        components = jnp.pad(components, ((0, m_pad - m), (0, 0)))
    if needs_mask:
        labels_2d = jnp.pad(labels_2d, ((0, n_pad - n), (0, m_pad - m)))

    grid = (n_pad // tm, m_pad // tn)

    kernel = functools.partial(
        _contrastive_loss_kernel,
        margin=float(margin),
        activation_opt=bool(activation_opt),
        inv_count=1.0 / float(n * m),
        n_valid=n,
        m_valid=m,
        needs_mask=needs_mask,
    )

    out = pl.pallas_call(
        kernel,
        out_shape=jax.ShapeDtypeStruct((1, 1), jnp.float32),
        grid=grid,
        in_specs=[
            pl.BlockSpec((tm, feat), lambda i, j: (i, 0)),   # reference tile
            pl.BlockSpec((tn, feat), lambda i, j: (j, 0)),   # components tile
            pl.BlockSpec((tm, tn), lambda i, j: (i, j)),     # labels tile
        ],
        # Same (0, 0) block every step -> resident VMEM accumulator.
        out_specs=pl.BlockSpec((1, 1), lambda i, j: (0, 0)),
        compiler_params=pltpu.CompilerParams(
            # Both axes reduce into the single shared scalar accumulator.
            dimension_semantics=("arbitrary", "arbitrary")),
    )(reference, components, labels_2d)

    return out[0, 0]


def _reference_loss(reference, components, labels, margin=2.0,
                    activation_opt=False):
    # Pure-JAX reference for correctness checking.
    diff = reference[:, None, :] - components[None, :, :]
    dist = jnp.sqrt(jnp.maximum(jnp.sum(diff * diff, axis=-1), 0.0)).reshape(-1)
    if activation_opt:
        dist = jax.nn.sigmoid(dist)
    hinge = jnp.maximum(margin - dist, 0.0)
    return jnp.mean((1.0 - labels) * dist ** 2 + labels * hinge ** 2)


if __name__ == "__main__":
    key = jax.random.PRNGKey(0)
    k1, k2, k3, k4, k5, k6 = jax.random.split(key, 6)

    # Case 1: tiny problem (single tile, padding/mask path exercised).
    N, M, D = 8, 8, 32
    reference = jax.random.normal(k1, (N, D), dtype=jnp.float32)
    components = jax.random.normal(k2, (M, D), dtype=jnp.float32)
    labels = jax.random.bernoulli(k3, 0.5, (N * M,)).astype(jnp.float32)

    for act in (False, True):
        loss = contrastive_loss(reference, components, labels,
                                margin=2.0, activation_opt=act)
        jax.block_until_ready(loss)
        ref = _reference_loss(reference, components, labels,
                              margin=2.0, activation_opt=act)
        assert jnp.allclose(loss, ref, rtol=1e-5, atol=1e-5), (act, loss, ref)

    # Case 2: non-aligned sizes -> multi-tile grid, accumulator and masking.
    N2, M2, D2 = 40, 300, 64
    ref2 = jax.random.normal(k4, (N2, D2), dtype=jnp.float32)
    comp2 = jax.random.normal(k5, (M2, D2), dtype=jnp.float32)
    lab2 = jax.random.bernoulli(k6, 0.5, (N2 * M2,)).astype(jnp.float32)

    loss2 = contrastive_loss(ref2, comp2, lab2, margin=2.0,
                             activation_opt=False, tile_m=32, tile_n=128)
    jax.block_until_ready(loss2)
    ref_l2 = _reference_loss(ref2, comp2, lab2, margin=2.0,
                             activation_opt=False)
    assert jnp.allclose(loss2, ref_l2, rtol=1e-4, atol=1e-5), (loss2, ref_l2)

    print("KERNEL_OK")
</pallas_src>

<mosaic_0001>
module attributes {stable_mosaic.version = 11 : i64} {
  func.func @_contrastive_loss_kernel(%arg0: i32, %arg1: i32, %arg2: memref<32x32xf32, #tpu.memory_space<vmem>>, %arg3: memref<128x32xf32, #tpu.memory_space<vmem>>, %arg4: memref<32x128xi8, #tpu.memory_space<vmem>>, %arg5: memref<1x1xf32, #tpu.memory_space<vmem>>) attributes {dimension_semantics = [#tpu.dimension_semantics<arbitrary>, #tpu.dimension_semantics<arbitrary>], iteration_bounds = array<i64: 1, 1>, scalar_prefetch = 0 : i64, scratch_operands = 0 : i64, tpu.core_type = #tpu.core_type<tc>, window_params = [{transform_indices = @transform_0, window_bounds = array<i64: 32, 32>}, {transform_indices = @transform_1, window_bounds = array<i64: 128, 32>}, {transform_indices = @transform_2, window_bounds = array<i64: 32, 128>}, {pipeline_mode = #tpu.pipeline_mode<synchronous>, transform_indices = @transform_3, window_bounds = array<i64: 1, 1>}]} {
    %c0_i32 = arith.constant 0 : i32
    %0 = arith.cmpi eq, %arg0, %c0_i32 : i32
    %c0_i32_0 = arith.constant 0 : i32
    %1 = arith.cmpi eq, %arg1, %c0_i32_0 : i32
    %2 = arith.andi %0, %1 : i1
    %3 = arith.extui %2 : i1 to i32
    %c0_i32_1 = arith.constant 0 : i32
    %4 = arith.cmpi ne, %3, %c0_i32_1 : i32
    scf.if %4 {
      %cst_25 = arith.constant 0.000000e+00 : f32
      %63 = vector.broadcast %cst_25 : f32 to vector<1x1xf32>
      %c0_26 = arith.constant 0 : index
      %c0_27 = arith.constant 0 : index
      %64 = vector.load %arg5[%c0_26, %c0_27] : memref<1x1xf32, #tpu.memory_space<vmem>>, vector<1x1xf32>
      tpu.vector_store %arg5[%c0_26, %c0_27], %63 {strides = array<i32>} : memref<1x1xf32, #tpu.memory_space<vmem>>, vector<1x1xf32>,
    } else {
    }
    %c0 = arith.constant 0 : index
    %c0_2 = arith.constant 0 : index
    %5 = vector.load %arg2[%c0, %c0_2] : memref<32x32xf32, #tpu.memory_space<vmem>>, vector<32x32xf32>
    %c0_3 = arith.constant 0 : index
    %c0_4 = arith.constant 0 : index
    %6 = vector.load %arg3[%c0_3, %c0_4] : memref<128x32xf32, #tpu.memory_space<vmem>>, vector<128x32xf32>
    %c0_5 = arith.constant 0 : index
    %c0_6 = arith.constant 0 : index
    %7 = vector.load %arg4[%c0_5, %c0_6] : memref<32x128xi8, #tpu.memory_space<vmem>>, vector<32x128xi8>
    %8 = arith.sitofp %7 : vector<32x128xi8> to vector<32x128xf32>
    %cst = arith.constant dense<0.000000e+00> : vector<32x128xf32>
    %9 = tpu.matmul %5, %6, %cst {dimension_numbers = #tpu.dot_dimension_numbers<[1], [1], [0], [0], [0, 0, 1, 0], [], []>} : vector<32x32xf32>, vector<128x32xf32>, vector<32x128xf32> -> vector<32x128xf32>
    %10 = arith.mulf %5, %5 : vector<32x32xf32>
    %cst_7 = arith.constant dense<0.000000e+00> : vector<32xf32>
    %11 = vector.multi_reduction <add>, %10, %cst_7 [1] : vector<32x32xf32> to vector<32xf32>
    %12 = vector.shape_cast %11 : vector<32xf32> to vector<32x1xf32>
    %cst_8 = arith.constant 1.000000e+00 : f32
    %13 = vector.broadcast %cst_8 : f32 to vector<1x32xf32>
    %14 = arith.mulf %6, %6 : vector<128x32xf32>
    %cst_9 = arith.constant dense<0.000000e+00> : vector<1x128xf32>
    %15 = tpu.matmul %13, %14, %cst_9 {dimension_numbers = #tpu.dot_dimension_numbers<[1], [1], [0], [0], [0, 0, 1, 0], [], []>} : vector<1x32xf32>, vector<128x32xf32>, vector<1x128xf32> -> vector<1x128xf32>
    %16 = vector.broadcast %12 : vector<32x1xf32> to vector<32x128xf32>
    %17 = vector.broadcast %15 : vector<1x128xf32> to vector<32x128xf32>
    %18 = arith.addf %16, %17 : vector<32x128xf32>
    %cst_10 = arith.constant 2.000000e+00 : f32
    %19 = vector.broadcast %cst_10 : f32 to vector<32x128xf32>
    %20 = arith.mulf %19, %9 : vector<32x128xf32>
    %21 = arith.subf %18, %20 : vector<32x128xf32>
    %cst_11 = arith.constant 0.000000e+00 : f32
    %22 = vector.broadcast %cst_11 : f32 to vector<32x128xf32>
    %23 = arith.maximumf %21, %22 : vector<32x128xf32>
    %24 = math.sqrt %23 : vector<32x128xf32>
    %cst_12 = arith.constant 2.000000e+00 : f32
    %25 = vector.broadcast %cst_12 : f32 to vector<32x128xf32>
    %26 = arith.subf %25, %24 : vector<32x128xf32>
    %cst_13 = arith.constant 0.000000e+00 : f32
    %27 = vector.broadcast %cst_13 : f32 to vector<32x128xf32>
    %28 = arith.maximumf %26, %27 : vector<32x128xf32>
    %cst_14 = arith.constant 1.000000e+00 : f32
    %29 = vector.broadcast %cst_14 : f32 to vector<32x128xf32>
    %30 = arith.subf %29, %8 : vector<32x128xf32>
    %31 = arith.mulf %30, %23 : vector<32x128xf32>
    %32 = arith.mulf %28, %28 : vector<32x128xf32>
    %33 = arith.mulf %8, %32 : vector<32x128xf32>
    %34 = arith.addf %31, %33 : vector<32x128xf32>
    %35 = tpu.iota {dimensions = array<i32: 0>} : vector<32x128xi32>
    %c32_i32 = arith.constant 32 : i32
    %36 = arith.muli %arg0, %c32_i32 : i32
    %37 = vector.broadcast %36 : i32 to vector<32x128xi32>
    %38 = arith.addi %35, %37 : vector<32x128xi32>
    %39 = tpu.iota {dimensions = array<i32: 1>} : vector<32x128xi32>
    %c128_i32 = arith.constant 128 : i32
    %40 = arith.muli %arg1, %c128_i32 : i32
    %41 = vector.broadcast %40 : i32 to vector<32x128xi32>
    %42 = arith.addi %39, %41 : vector<32x128xi32>
    %c8_i32 = arith.constant 8 : i32
    %43 = vector.broadcast %c8_i32 : i32 to vector<32x128xi32>
    %44 = arith.cmpi slt, %38, %43 : vector<32x128xi32>
    %c8_i32_15 = arith.constant 8 : i32
    %45 = vector.broadcast %c8_i32_15 : i32 to vector<32x128xi32>
    %46 = arith.cmpi slt, %42, %45 : vector<32x128xi32>
    %47 = arith.andi %44, %46 : vector<32x128xi1>
    %cst_16 = arith.constant 0.000000e+00 : f32
    %48 = vector.broadcast %cst_16 : f32 to vector<32x128xf32>
    %49 = arith.select %47, %34, %48 : vector<32x128xi1>, vector<32x128xf32>
    %c0_17 = arith.constant 0 : index
    %c0_18 = arith.constant 0 : index
    %50 = vector.load %arg5[%c0_17, %c0_18] : memref<1x1xf32, #tpu.memory_space<vmem>>, vector<1x1xf32>
    %51 = vector.shape_cast %49 : vector<32x128xf32> to vector<1x32x128xf32>
    %cst_19 = arith.constant dense<0.000000e+00> : vector<1xf32>
    %52 = vector.multi_reduction <add>, %51, %cst_19 [1, 2] : vector<1x32x128xf32> to vector<1xf32>
    %53 = vector.shape_cast %52 : vector<1xf32> to vector<1x1x1xf32>
    %54 = vector.extract %53[0, 0, 0] : f32 from vector<1x1x1xf32>
    %55 = vector.broadcast %54 : f32 to vector<1x1xf32>
    %56 = arith.addf %50, %55 : vector<1x1xf32>
    %c0_20 = arith.constant 0 : index
    %c0_21 = arith.constant 0 : index
    %57 = vector.load %arg5[%c0_20, %c0_21] : memref<1x1xf32, #tpu.memory_space<vmem>>, vector<1x1xf32>
    tpu.vector_store %arg5[%c0_20, %c0_21], %56 {strides = array<i32>} : memref<1x1xf32, #tpu.memory_space<vmem>>, vector<1x1xf32>,
    %c0_i32_22 = arith.constant 0 : i32
    %58 = arith.cmpi eq, %arg0, %c0_i32_22 : i32
    %c0_i32_23 = arith.constant 0 : i32
    %59 = arith.cmpi eq, %arg1, %c0_i32_23 : i32
    %60 = arith.andi %58, %59 : i1
    %61 = arith.extui %60 : i1 to i32
    %c0_i32_24 = arith.constant 0 : i32
    %62 = arith.cmpi ne, %61, %c0_i32_24 : i32
    scf.if %62 {
      %c0_25 = arith.constant 0 : index
      %c0_26 = arith.constant 0 : index
      %63 = vector.load %arg5[%c0_25, %c0_26] : memref<1x1xf32, #tpu.memory_space<vmem>>, vector<1x1xf32>
      %cst_27 = arith.constant 1.562500e-02 : f32
      %64 = vector.broadcast %cst_27 : f32 to vector<1x1xf32>
      %65 = arith.mulf %63, %64 : vector<1x1xf32>
      %c0_28 = arith.constant 0 : index
      %c0_29 = arith.constant 0 : index
      %66 = vector.load %arg5[%c0_28, %c0_29] : memref<1x1xf32, #tpu.memory_space<vmem>>, vector<1x1xf32>
      tpu.vector_store %arg5[%c0_28, %c0_29], %65 {strides = array<i32>} : memref<1x1xf32, #tpu.memory_space<vmem>>, vector<1x1xf32>,
    } else {
    }
    return
  }
  func.func @transform_0(%arg0: i32, %arg1: i32) -> (i32, i32) {
    %c0_i32 = arith.constant 0 : i32
    %c0_i32_0 = arith.constant 0 : i32
    return %arg0, %c0_i32 : i32, i32
  }
  func.func @transform_1(%arg0: i32, %arg1: i32) -> (i32, i32) {
    %c0_i32 = arith.constant 0 : i32
    %c0_i32_0 = arith.constant 0 : i32
    return %arg1, %c0_i32 : i32, i32
  }
  func.func @transform_2(%arg0: i32, %arg1: i32) -> (i32, i32) {
    %c0_i32 = arith.constant 0 : i32
    return %arg0, %arg1 : i32, i32
  }
  func.func @transform_3(%arg0: i32, %arg1: i32) -> (i32, i32) {
    %c0_i32 = arith.constant 0 : i32
    %c0_i32_0 = arith.constant 0 : i32
    %c0_i32_1 = arith.constant 0 : i32
    return %c0_i32, %c0_i32_0 : i32, i32
  }
}

</mosaic_0001>

<bundles_post_ra>
// kernel: tpu_custom_call.1
= control target key start
LH: loop header
LB: loop body
LE: loop exit
PB: predicated region body
PF: predicated region fallthrough
CT: control target
= control target key end

     0   :  { %vm52_vm0 = vcmask 261120   ;;  %v669_v2 = vmov 0.0   ;;  %vm670_vm1 = vmmov 0   ;;  %s834_s0 = inlined_call_operand.vmem [shape: f32[32,32], index: 0, kind: input, shape index: {}]   ;;  %s835_s1 = inlined_call_operand.vmem [shape: f32[128,32], index: 1, kind: input, shape index: {}]   ;;  %s836_s2 = inlined_call_operand.vmem [shape: s8[32,128], index: 2, kind: input, shape index: {}]   ;;  %s837_s3 = inlined_call_operand.hbm [shape: f32[1,1], index: 3, kind: output, shape index: {}]  }
   0x1   :  { %v42_v0 = vld [vmem:[%s835_s1 + $0x78] sm:$0xff]  ;;  %v41_v1 = vld [vmem:[%s835_s1 + $0x70] sm:$0xff]  ;;  %604 = vmatprep.subr.mxu1 %v669_v2  ;;  %636 = vmatprep.mubr.msk.f32.mxu1 %vm670_vm1, %v669_v2  ;;  %v40_v5 = vld [vmem:[%s835_s1 + $0x68] sm:$0xff] }
   0x2   :  { %566 = vmatprep.subr.msk.mxu0 %vm52_vm0, %v42_v0  ;;  %v229_v3 = vmul.f32 %v42_v0, %v42_v0  ;;  %v228_v4 = vmul.f32 %v41_v1, %v41_v1  ;;  %v23_v6 = vld [vmem:[%s834_s0] sm:$0xff] }
   0x3   :  { %567 = vmatpush3.xpose.msk.msra.mxu0 %vm52_vm0, %v42_v0  ;;  %598 = vmatprep.mubr.msk.f32.mxu0 %vm52_vm0, %v23_v6  ;;  %v198_v7 = vmul.f32 %v23_v6, %v23_v6 }
   0x4   :  { %605 = vmatpush3.xpose.msk.msra.mxu1 %vm52_vm0, %v229_v3  ;;  %568 = vmatprep.subr.msk.mxu0 %vm52_vm0, %v41_v1 }
   0x5   :  { %606 = vmatprep.subr.mxu1 %v669_v2 }
   0x7   :  { %569 = vmatpush3.xpose.msk.msra.mxu0 %vm52_vm0, %v41_v1 }
   0x8   :  { %8 = vsyncpa [#allocation3], 0  ;;  %607 = vmatpush3.xpose.msk.msra.mxu1 %vm52_vm0, %v228_v4  ;;  %570 = vmatprep.subr.msk.mxu0 %vm52_vm0, %v40_v5  ;;  %v227_v8 = vmul.f32 %v40_v5, %v40_v5  ;;  %v39_v9 = vld [vmem:[%s835_s1 + $0x60] sm:$0xff]  ;;  %v202_v10 = vsel %vm52_vm0, %v198_v7, 0.0  ;;  %v38_v12 = vld [vmem:[%s835_s1 + $0x58] sm:$0xff]  ;;  %v671_v37 = vmov 1.0   ;;  %v351_v40 = vlaneseq }
   0x9   :  { %608 = vmatprep.subr.mxu1 %v669_v2  ;;  %203 = vadd.xlane.f32.xlu0 %v202_v10  ;;  %v226_v11 = vmul.f32 %v39_v9, %v39_v9  ;;  %v225_v13 = vmul.f32 %v38_v12, %v38_v12  ;;  %v37_v14 = vld [vmem:[%s835_s1 + $0x50] sm:$0xff]  ;;  %v36_v16 = vld [vmem:[%s835_s1 + $0x48] sm:$0xff]  ;;  %v35_v18 = vld [vmem:[%s835_s1 + $0x40] sm:$0xff]  ;;  %vm21_vm5 = vcmask 0   ;;  %s672_s25 = smov [#allocation2]  }
   0xa   :  { %v224_v15 = vmul.f32 %v37_v14, %v37_v14  ;;  %v223_v17 = vmul.f32 %v36_v16, %v36_v16  ;;  %v222_v19 = vmul.f32 %v35_v18, %v35_v18  ;;  %v34_v20 = vld [vmem:[%s835_s1 + $0x38] sm:$0xff]  ;;  %v33_v22 = vld [vmem:[%s835_s1 + $0x30] sm:$0xff]  ;;  %v32_v24 = vld [vmem:[%s835_s1 + $0x28] sm:$0xff]  ;;  %v352_v41 = vshrl.u32 %v351_v40, 7  ;;  %22 = vst.msk [vmem:[#allocation2] sm:$0x1] %vm21_vm5, %v669_v2 }
   0xb   :  { %571 = vmatpush3.xpose.msk.msra.mxu0 %vm52_vm0, %v40_v5  ;;  %v221_v21 = vmul.f32 %v34_v20, %v34_v20  ;;  %v220_v23 = vmul.f32 %v33_v22, %v33_v22  ;;  %v219_v25 = vmul.f32 %v32_v24, %v32_v24  ;;  %v31_v26 = vld [vmem:[%s835_s1 + $0x20] sm:$0xff]  ;;  %v30_v28 = vld [vmem:[%s835_s1 + $0x18] sm:$0xff]  ;;  %v29_v30 = vld [vmem:[%s835_s1 + $0x10] sm:$0xff]  ;;  %v439_v0 = vand.u32 127, %v351_v40  ;;  %s484_s26 = sshll.u32 %s672_s25, 4  ;;  %s485_s26 = int_to_ptr.vmem [resolvable:$true] %s484_s26 }
   0xc   :  { %609 = vmatpush3.xpose.msk.msra.mxu1 %vm52_vm0, %v227_v8  ;;  %572 = vmatprep.subr.msk.mxu0 %vm52_vm0, %v39_v9  ;;  %v218_v27 = vmul.f32 %v31_v26, %v31_v26  ;;  %v217_v29 = vmul.f32 %v30_v28, %v30_v28  ;;  %v216_v31 = vmul.f32 %v29_v30, %v29_v30  ;;  %v28_v32 = vld [vmem:[%s835_s1 + $0x8] sm:$0xff]  ;;  %v27_v34 = vld [vmem:[%s835_s1] sm:$0xff]  ;;  %v25_v38 = vld [vmem:[%s834_s0 + $0x10] sm:$0xff]  ;;  %v353_v42 = vsub.s32 0, %v352_v41  ;;  %s647_s27 = scalar_lea.vmem %s485_s26, 16  ;;  %s651_s28 = scalar_lea.vmem %s485_s26, 32 }
   0xd   :  { %610 = vmatprep.subr.mxu1 %v669_v2  ;;  %v215_v33 = vmul.f32 %v28_v32, %v28_v32  ;;  %v214_v35 = vmul.f32 %v27_v34, %v27_v34  ;;  %v24_v36 = vld [vmem:[%s834_s0 + $0x8] sm:$0xff]  ;;  %v26_v39 = vld [vmem:[%s834_s0 + $0x18] sm:$0xff]  ;;  %v43_v53 = vld [vmem:[%s836_s2] sm:$0x3]  ;;  %vm447_vm4 = vcmp.lt.s32.totalorder %v439_v0, 8  ;;  %p648_p0 = scmp.ne.s32.totalorder %s485_s26, %s647_s27  ;;  %p652_p1 = scmp.lt.s32.totalorder %s485_s26, %s485_s26 }
   0xe   :  { %v44_v54 = vunpack.c.0.s8 %v43_v53  ;;  %p653_p2 = scmp.lt.s32.totalorder %s651_s28, %s647_s27 }
   0xf   :  { %573 = vmatpush3.xpose.msk.msra.mxu0 %vm52_vm0, %v39_v9 }
  0x10   :  { %611 = vmatpush3.xpose.msk.msra.mxu1 %vm52_vm0, %v226_v11  ;;  %574 = vmatprep.subr.msk.mxu0 %vm52_vm0, %v38_v12  ;;  %v48_v58 = vcvt.s32.f32 %v44_v54  ;;  %p654_p3 = por %p653_p2, %p652_p1 }
  0x11   :  { %612 = vmatprep.subr.mxu1 %v669_v2 }
  0x12   :  { %v407_v63 = vsub.f32 1.0, %v48_v58  ;;  %p655_p4 = pnand %p654_p3, %p648_p0 }
  0x13   :  { %575 = vmatpush3.xpose.msk.msra.mxu0 %vm52_vm0, %v38_v12 }
  0x14   :  { %613 = vmatpush3.xpose.msk.msra.mxu1 %vm52_vm0, %v225_v13  ;;  %576 = vmatprep.subr.msk.mxu0 %vm52_vm0, %v37_v14 }
  0x15   :  { %614 = vmatprep.subr.mxu1 %v669_v2 }
  0x17   :  { %577 = vmatpush3.xpose.msk.msra.mxu0 %vm52_vm0, %v37_v14 }
  0x18   :  { %615 = vmatpush3.xpose.msk.msra.mxu1 %vm52_vm0, %v224_v15  ;;  %578 = vmatprep.subr.msk.mxu0 %vm52_vm0, %v36_v16 }
  0x19   :  { %616 = vmatprep.subr.mxu1 %v669_v2 }
  0x1b   :  { %579 = vmatpush3.xpose.msk.msra.mxu0 %vm52_vm0, %v36_v16  ;;  %v456_v16 = vld [vmem:[#allocation2] sm:$0x1] }
  0x1c   :  { %617 = vmatpush3.xpose.msk.msra.mxu1 %vm52_vm0, %v223_v17  ;;  %580 = vmatprep.subr.msk.mxu0 %vm52_vm0, %v35_v18 }
  0x1d   :  { %618 = vmatprep.subr.mxu1 %v669_v2 }
  0x1f   :  { %581 = vmatpush3.xpose.msk.msra.mxu0 %vm52_vm0, %v35_v18 }
  0x20   :  { %619 = vmatpush3.xpose.msk.msra.mxu1 %vm52_vm0, %v222_v19  ;;  %582 = vmatprep.subr.msk.mxu0 %vm52_vm0, %v34_v20 }
  0x21   :  { %620 = vmatprep.subr.mxu1 %v669_v2 }
  0x23   :  { %583 = vmatpush3.xpose.msk.msra.mxu0 %vm52_vm0, %v34_v20 }
  0x24   :  { %621 = vmatpush3.xpose.msk.msra.mxu1 %vm52_vm0, %v221_v21  ;;  %584 = vmatprep.subr.msk.mxu0 %vm52_vm0, %v33_v22 }
  0x25   :  { %622 = vmatprep.subr.mxu1 %v669_v2 }
  0x27   :  { %585 = vmatpush3.xpose.msk.msra.mxu0 %vm52_vm0, %v33_v22 }
  0x28   :  { %623 = vmatpush3.xpose.msk.msra.mxu1 %vm52_vm0, %v220_v23  ;;  %586 = vmatprep.subr.msk.mxu0 %vm52_vm0, %v32_v24 }
  0x29   :  { %624 = vmatprep.subr.mxu1 %v669_v2 }
  0x2b   :  { %587 = vmatpush3.xpose.msk.msra.mxu0 %vm52_vm0, %v32_v24 }
  0x2c   :  { %625 = vmatpush3.xpose.msk.msra.mxu1 %vm52_vm0, %v219_v25  ;;  %588 = vmatprep.subr.msk.mxu0 %vm52_vm0, %v31_v26 }
  0x2d   :  { %626 = vmatprep.subr.mxu1 %v669_v2 }
  0x2f   :  { %589 = vmatpush3.xpose.msk.msra.mxu0 %vm52_vm0, %v31_v26 }
  0x30   :  { %627 = vmatpush3.xpose.msk.msra.mxu1 %vm52_vm0, %v218_v27  ;;  %590 = vmatprep.subr.msk.mxu0 %vm52_vm0, %v30_v28 }
  0x31   :  { %628 = vmatprep.subr.mxu1 %v669_v2 }
  0x33   :  { %591 = vmatpush3.xpose.msk.msra.mxu0 %vm52_vm0, %v30_v28 }
  0x34   :  { %629 = vmatpush3.xpose.msk.msra.mxu1 %vm52_vm0, %v217_v29  ;;  %592 = vmatprep.subr.msk.mxu0 %vm52_vm0, %v29_v30 }
  0x35   :  { %630 = vmatprep.subr.mxu1 %v669_v2 }
  0x37   :  { %593 = vmatpush3.xpose.msk.msra.mxu0 %vm52_vm0, %v29_v30 }
  0x38   :  { %631 = vmatpush3.xpose.msk.msra.mxu1 %vm52_vm0, %v216_v31  ;;  %594 = vmatprep.subr.msk.mxu0 %vm52_vm0, %v28_v32 }
  0x39   :  { %632 = vmatprep.subr.mxu1 %v669_v2 }
  0x3b   :  { %595 = vmatpush3.xpose.msk.msra.mxu0 %vm52_vm0, %v28_v32 }
  0x3c   :  { %633 = vmatpush3.xpose.msk.msra.mxu1 %vm52_vm0, %v215_v33  ;;  %596 = vmatprep.subr.msk.mxu0 %vm52_vm0, %v27_v34 }
  0x3d   :  { %634 = vmatprep.subr.mxu1 %v669_v2 }
  0x3f   :  { %597 = vmatpush3.xpose.msk.msra.mxu0 %vm52_vm0, %v27_v34 }
  0x40   :  { %635 = vmatpush3.xpose.msk.msra.mxu1 %vm52_vm0, %v214_v35 }
  0x42   :  { %599 = vmatmul.mubr.msk.f32.vlgmr.msra.gmra.mxu0 %vm52_vm0, %v24_v36 }
  0x43   :  { %637 = vmatmul.mubr.msk.f32.vlgmr.msra.gmra.mxu1 %vm52_vm0, %v671_v37  ;;  %601 = vmatprep.mubr.msk.f32.mxu0 %vm52_vm0, %v25_v38 }
  0x46   :  { %602 = vmatmul.mubr.msk.f32.gmra.mxu0 %vm52_vm0, %v26_v39 }
  0x92   :  { %v204_v45 = vpop.xlane.xlu0 %203 }
 0x102   :  { %v600_v43 = vpop.f32.mrf.mxu0 }
 0x103   :  { %v347_v44 = vpop.f32.mrf.mxu1 }
 0x104   :  { %v354_v46 = vrot.slane %v347_v44, %v353_v42  ;;  %v179_v47 = vpop.f32.mrf.mxu0 }
 0x105   :  { %v359_v48 = vmul.f32 2.0, %v179_v47  ;;  %v638_v49 = vpop.f32.mrf.mxu1 }
 0x106   :  { %v355_v50 = vadd.f32 %v354_v46, %v204_v45  ;;  %v603_v7 = vpop.f32.mrf.mxu0 }
 0x108   :  { %v363_v51 = vsub.f32 %v355_v50, %v359_v48  ;;  %v189_v8 = vpop.f32.mrf.mxu0 }
 0x10a   :  { %v367_v52 = vmax.f32 %v363_v51, 0.0 }
 0x10c   :  { %645 = vrsqrt.f32 %v367_v52  ;;  %vm373_vm2 = vcmp.eq.f32.partialorder %v367_v52, inf  ;;  %v376_v57 = vand.u32 2147483648, %v367_v52  ;;  %vm375_vm3 = vcmp.eq.f32.partialorder %v367_v52, 0.0 }
 0x10d   :  { %v411_v3 = vmul.f32 %v407_v63, %v367_v52 }
 0x119   :  { %v646_v55 = vpop.eup %645 }
 0x11a   :  { %v372_v56 = vmul.f32 %v646_v55, %v367_v52 }
 0x11c   :  { %v374_v59 = vsel %vm373_vm2, %v367_v52, %v372_v56 }
 0x11d   :  { %v377_v60 = vsel %vm375_vm3, %v376_v57, %v374_v59 }
 0x11e   :  { %v399_v61 = vsub.f32 2.0, %v377_v60 }
 0x120   :  { %v403_v62 = vmax.f32 %v399_v61, 0.0 }
 0x122   :  { %v415_v1 = vmul.f32 %v403_v62, %v403_v62 }
 0x124   :  { %v419_v4 = vmul.f32 %v415_v1, %v48_v58 }
 0x126   :  { %v423_v5 = vadd.f32 %v419_v4, %v411_v3 }
 0x128   :  { %v452_v6 = vsel %vm447_vm4, %v423_v5, 0.0 }
 0x129   :  { %460 = vadd.xlane.f32.xlu0 %v452_v6 }
 0x1b2   :  { %v461_v9 = vpop.xlane.xlu0 %460 }
 0x1b3   :  { %v462_v10 = vrot.slane %v461_v9, 4 }
 0x1b5   :  { %v463_v11 = vadd.f32 %v462_v10, %v461_v9 }
 0x1b7   :  { %v464_v12 = vrot.slane %v463_v11, 2 }
 0x1b9   :  { %v465_v13 = vadd.f32 %v464_v12, %v463_v11 }
 0x1bb   :  { %v466_v14 = vrot.slane %v465_v13, 1 }
 0x1bd   :  { %v467_v15 = vadd.f32 %v466_v14, %v465_v13 }
 0x1bf   :  { %639 = vpush %v467_v15 }
 0x1f0   :  { %s640_s2 = spop %639 }
 0x1f1   :  { %v469_v17 = vstv %s640_s2 }
 0x1f2   :  { %v470_v18 = vadd.f32 %v469_v17, %v456_v16 }
 0x1f4   :  { %472 = vst.msk [vmem:[#allocation2] sm:$0x1] %vm21_vm5, %v470_v18 }
 0x1fb   :  { %v475_v19 = vld [vmem:[#allocation2] sm:$0x1] }
 0x1fc   :  { %v476_v2 = vmul.f32 0.015625, %v475_v19 }
 0x1fe   :  { %477 = vst.msk [vmem:[#allocation2] sm:$0x1] %vm21_vm5, %v476_v2 }
 0x1ff   :  { %658 = shalt.err (!%p655_p4)
}
 0x200   :  { %487 = dma.vmem_to_hbm [thread:$0]  %s485_s26, 16, %s837_s3, [#allocation3]  }
 0x201   :  { %667 = dma.done.wait [#allocation3], 16  }
 0x202   :  { %668 = vsyncadd [#allocation3], 4294967280 }
 0x203   :  { %491 = vsyncpa [#allocation3], 1 }

</bundles_post_ra>
